<compile_context>
chip_gen: v5e
topology: v5e:2x2
jax: 0.10.0
libtpu: 0.0.40
codegen_flags: <defaults>
</compile_context>

<pallas_src>
import functools

import jax
import jax.numpy as jnp
from jax.experimental import pallas as pl
from jax.experimental.pallas import tpu as pltpu

LANE = 128      # vreg lane width; packed head/output widths padded to this.
TM_CAP = 2048   # batch-tile cap (sweep 512 / 1024 / 2048).


def _round_up(n, m):
    return (n + m - 1) // m * m


# ----------------------------------------------------------------------------
# Kernel
# ----------------------------------------------------------------------------
def ppo_kernel(x_ref, w_ref, b_ref, out_ref, *, sd, sdp, lane):
    """One batch tile of the fused actor-critic MLP.

    x_ref:   (TM, sd)              input rows (no feature padding)
    w_ref:   (sdp + 2*lane, lane)  packed weights: [W1(pad) | W_heads1 | W_heads2]
    b_ref:   (3, lane)             packed biases:  [b1 ; b_heads1 ; b_heads2]
    out_ref: (TM, lane)            lanes [0:A) = logits, lane A = value, rest 0
    """
    x = x_ref[...]

    w1 = w_ref[0:sd, :]                          # (sd, lane)
    wh1 = w_ref[sdp:sdp + lane, :]               # (lane, lane)  fused wa1|wc1
    wh2 = w_ref[sdp + lane:sdp + 2 * lane, :]    # (lane, lane)  block-diag wa2/wc2

    b = b_ref[...]                               # (3, lane)

    # shared = ReLU(x @ W1 + b1); unused lanes stay exactly 0 pre-bias.
    h = jnp.dot(x, w1, preferred_element_type=jnp.float32) + b[0:1, :]
    h = jnp.maximum(h, 0.0)

    # fused first head layer: lanes [0:H) actor hidden, [H:2H) critic hidden.
    ac = jnp.dot(h, wh1, preferred_element_type=jnp.float32) + b[1:2, :]
    ac = jnp.maximum(ac, 0.0)

    # block-diagonal second head layer -> lane-dense output slab.
    out_ref[...] = (
        jnp.dot(ac, wh2, preferred_element_type=jnp.float32) + b[2:3, :]
    )


# ----------------------------------------------------------------------------
# Wrapper
# ----------------------------------------------------------------------------
def ppo_actor_critic_forward(x, w_pack, b_pack, *, state_dim, action_dim):
    """x: (B, state_dim) f32. Returns (logits (B, action_dim), value (B, 1))."""
    B, sd = x.shape
    assert sd == state_dim
    sdp = w_pack.shape[0] - 2 * LANE  # 8-aligned row offset of the head slabs

    # Batch: pad only to a multiple of 8 sublanes (and only when necessary).
    b8 = _round_up(B, 8)
    if b8 != B:
        x = jnp.pad(x, ((0, b8 - B), (0, 0)))

    # Tile: big enough to amortize per-step overhead, but split so that any
    # batch with >= 2 tiles shards across both v7x TensorCores ("parallel").
    tm = min(TM_CAP, max(8, _round_up(pl.cdiv(b8, 2), 8)))
    grid = (pl.cdiv(b8, tm),)   # ragged final block handled by Pallas

    kernel = functools.partial(ppo_kernel, sd=sd, sdp=sdp, lane=LANE)

    out = pl.pallas_call(
        kernel,
        out_shape=jax.ShapeDtypeStruct((b8, LANE), jnp.float32),
        grid=grid,
        in_specs=[
            pl.BlockSpec((tm, sd), lambda i: (i, 0)),           # x: no feature pad
            pl.BlockSpec(w_pack.shape, lambda i: (0, 0)),       # VMEM-resident weights
            pl.BlockSpec(b_pack.shape, lambda i: (0, 0)),       # VMEM-resident biases
        ],
        out_specs=pl.BlockSpec((tm, LANE), lambda i: (i, 0)),
        compiler_params=pltpu.CompilerParams(
            dimension_semantics=("parallel",)),
    )(x, w_pack, b_pack)

    logits = out[:B, :action_dim]
    value = out[:B, action_dim:action_dim + 1]
    return logits, value


# ----------------------------------------------------------------------------
# Parameter init / packing / reference
# ----------------------------------------------------------------------------
def init_params(key, state_dim, action_dim, hidden_size):
    """PyTorch-Linear-style init. Weights stored as (in, out), biases (1, out)."""
    def linear(key, fan_in, fan_out):
        kw, kb = jax.random.split(key)
        bound = 1.0 / jnp.sqrt(fan_in)
        w = jax.random.uniform(kw, (fan_in, fan_out), jnp.float32, -bound, bound)
        b = jax.random.uniform(kb, (1, fan_out), jnp.float32, -bound, bound)
        return w, b

    k1, k2, k3, k4, k5 = jax.random.split(key, 5)
    w1, b1 = linear(k1, state_dim, hidden_size)
    wa1, ba1 = linear(k2, hidden_size, hidden_size)
    wa2, ba2 = linear(k3, hidden_size, action_dim)
    wc1, bc1 = linear(k4, hidden_size, hidden_size)
    wc2, bc2 = linear(k5, hidden_size, 1)
    return dict(w1=w1, b1=b1, wa1=wa1, ba1=ba1, wa2=wa2, ba2=ba2,
                wc1=wc1, bc1=bc1, wc2=wc2, bc2=bc2)


def pack_params(p, state_dim, action_dim, hidden, lane=LANE):
    """Pack the 10 parameter tensors into one weight slab + one bias slab."""
    assert 2 * hidden <= lane, "packed head width must fit one vreg lane tile"
    assert action_dim + 1 <= lane, "packed output width must fit 128 lanes"
    sdp = _round_up(state_dim, 8)   # keep head slabs 8-sublane aligned
    h2 = 2 * hidden

    w1 = jnp.zeros((sdp, lane), jnp.float32).at[:state_dim, :hidden].set(p["w1"])
    wh1 = (jnp.zeros((lane, lane), jnp.float32)
           .at[:hidden, :hidden].set(p["wa1"])
           .at[:hidden, hidden:h2].set(p["wc1"]))
    wh2 = (jnp.zeros((lane, lane), jnp.float32)
           .at[:hidden, :action_dim].set(p["wa2"])
           .at[hidden:h2, action_dim:action_dim + 1].set(p["wc2"]))
    w_pack = jnp.concatenate([w1, wh1, wh2], axis=0)         # (sdp + 2*lane, lane)

    b1 = jnp.zeros((1, lane), jnp.float32).at[:, :hidden].set(p["b1"])
    bh1 = (jnp.zeros((1, lane), jnp.float32)
           .at[:, :hidden].set(p["ba1"])
           .at[:, hidden:h2].set(p["bc1"]))
    bh2 = (jnp.zeros((1, lane), jnp.float32)
           .at[:, :action_dim].set(p["ba2"])
           .at[:, action_dim:action_dim + 1].set(p["bc2"]))
    b_pack = jnp.concatenate([b1, bh1, bh2], axis=0)          # (3, lane)
    return w_pack, b_pack


def reference_forward(x, p):
    """Pure-JAX reference mirroring the PyTorch forward."""
    h = jnp.maximum(x @ p["w1"] + p["b1"], 0.0)
    a = jnp.maximum(h @ p["wa1"] + p["ba1"], 0.0)
    logits = a @ p["wa2"] + p["ba2"]
    c = jnp.maximum(h @ p["wc1"] + p["bc1"], 0.0)
    value = c @ p["wc2"] + p["bc2"]
    return logits, value


if __name__ == "__main__":
    state_dim = 16
    action_dim = 4
    hidden_size = 64  # module default

    key = jax.random.PRNGKey(0)
    kx, kp, kx2 = jax.random.split(key, 3)
    params = init_params(kp, state_dim, action_dim, hidden_size)
    w_pack, b_pack = pack_params(params, state_dim, action_dim, hidden_size)

    # --- small-shape check (single grid step) ---
    B = 8
    x = jax.random.normal(kx, (B, state_dim), dtype=jnp.float32)
    logits, value = ppo_actor_critic_forward(
        x, w_pack, b_pack, state_dim=state_dim, action_dim=action_dim)
    jax.block_until_ready((logits, value))
    ref_logits, ref_value = reference_forward(x, params)
    assert logits.shape == (B, action_dim)
    assert value.shape == (B, 1)
    assert jnp.allclose(logits, ref_logits, atol=1e-5, rtol=1e-5)
    assert jnp.allclose(value, ref_value, atol=1e-5, rtol=1e-5)

    # --- 2-step grid (megacore sharding) with a ragged final tile ---
    B2 = 200
    x2 = jax.random.normal(kx2, (B2, state_dim), dtype=jnp.float32)
    logits2, value2 = ppo_actor_critic_forward(
        x2, w_pack, b_pack, state_dim=state_dim, action_dim=action_dim)
    jax.block_until_ready((logits2, value2))
    ref_logits2, ref_value2 = reference_forward(x2, params)
    assert jnp.allclose(logits2, ref_logits2, atol=1e-5, rtol=1e-5)
    assert jnp.allclose(value2, ref_value2, atol=1e-5, rtol=1e-5)

    print("KERNEL_OK")
</pallas_src>

<mosaic_0001>
module attributes {stable_mosaic.version = 11 : i64} {
  func.func @ppo_kernel(%arg0: i32, %arg1: memref<8x16xf32, #tpu.memory_space<vmem>>, %arg2: memref<272x128xf32, #tpu.memory_space<vmem>>, %arg3: memref<3x128xf32, #tpu.memory_space<vmem>>, %arg4: memref<8x128xf32, #tpu.memory_space<vmem>>) attributes {dimension_semantics = [#tpu.dimension_semantics<parallel>], iteration_bounds = array<i64: 1>, scalar_prefetch = 0 : i64, scratch_operands = 0 : i64, tpu.core_type = #tpu.core_type<tc>, window_params = [{transform_indices = @transform_0, window_bounds = array<i64: 8, 16>}, {pipeline_mode = #tpu.pipeline_mode<synchronous>, transform_indices = @transform_1, window_bounds = array<i64: 272, 128>}, {pipeline_mode = #tpu.pipeline_mode<synchronous>, transform_indices = @transform_2, window_bounds = array<i64: 3, 128>}, {transform_indices = @transform_3, window_bounds = array<i64: 8, 128>}]} {
    %c0 = arith.constant 0 : index
    %c0_0 = arith.constant 0 : index
    %0 = vector.load %arg1[%c0, %c0_0] : memref<8x16xf32, #tpu.memory_space<vmem>>, vector<8x16xf32>
    %c0_1 = arith.constant 0 : index
    %c0_2 = arith.constant 0 : index
    %1 = vector.load %arg2[%c0_1, %c0_2] : memref<272x128xf32, #tpu.memory_space<vmem>>, vector<16x128xf32>
    %c16 = arith.constant 16 : index
    %c0_3 = arith.constant 0 : index
    %2 = vector.load %arg2[%c16, %c0_3] : memref<272x128xf32, #tpu.memory_space<vmem>>, vector<128x128xf32>
    %c144 = arith.constant 144 : index
    %c0_4 = arith.constant 0 : index
    %3 = vector.load %arg2[%c144, %c0_4] : memref<272x128xf32, #tpu.memory_space<vmem>>, vector<128x128xf32>
    %c0_5 = arith.constant 0 : index
    %c0_6 = arith.constant 0 : index
    %4 = vector.load %arg3[%c0_5, %c0_6] : memref<3x128xf32, #tpu.memory_space<vmem>>, vector<3x128xf32>
    %cst = arith.constant dense<0.000000e+00> : vector<8x128xf32>
    %5 = tpu.matmul %0, %1, %cst {dimension_numbers = #tpu.dot_dimension_numbers<[1], [0], [0], [1], [0, 0, 1, 1], [], []>} : vector<8x16xf32>, vector<16x128xf32>, vector<8x128xf32> -> vector<8x128xf32>
    %6 = vector.extract_strided_slice %4 {offsets = [0, 0], sizes = [1, 128], strides = [1, 1]} : vector<3x128xf32> to vector<1x128xf32>
    %7 = vector.broadcast %6 : vector<1x128xf32> to vector<8x128xf32>
    %8 = arith.addf %5, %7 : vector<8x128xf32>
    %cst_7 = arith.constant 0.000000e+00 : f32
    %9 = vector.broadcast %cst_7 : f32 to vector<8x128xf32>
    %10 = arith.maximumf %8, %9 : vector<8x128xf32>
    %cst_8 = arith.constant dense<0.000000e+00> : vector<8x128xf32>
    %11 = tpu.matmul %10, %2, %cst_8 {dimension_numbers = #tpu.dot_dimension_numbers<[1], [0], [0], [1], [0, 0, 1, 1], [], []>} : vector<8x128xf32>, vector<128x128xf32>, vector<8x128xf32> -> vector<8x128xf32>
    %12 = vector.extract_strided_slice %4 {offsets = [1, 0], sizes = [1, 128], strides = [1, 1]} : vector<3x128xf32> to vector<1x128xf32>
    %13 = vector.broadcast %12 : vector<1x128xf32> to vector<8x128xf32>
    %14 = arith.addf %11, %13 : vector<8x128xf32>
    %cst_9 = arith.constant 0.000000e+00 : f32
    %15 = vector.broadcast %cst_9 : f32 to vector<8x128xf32>
    %16 = arith.maximumf %14, %15 : vector<8x128xf32>
    %cst_10 = arith.constant dense<0.000000e+00> : vector<8x128xf32>
    %17 = tpu.matmul %16, %3, %cst_10 {dimension_numbers = #tpu.dot_dimension_numbers<[1], [0], [0], [1], [0, 0, 1, 1], [], []>} : vector<8x128xf32>, vector<128x128xf32>, vector<8x128xf32> -> vector<8x128xf32>
    %18 = vector.extract_strided_slice %4 {offsets = [2, 0], sizes = [1, 128], strides = [1, 1]} : vector<3x128xf32> to vector<1x128xf32>
    %19 = vector.broadcast %18 : vector<1x128xf32> to vector<8x128xf32>
    %20 = arith.addf %17, %19 : vector<8x128xf32>
    %c0_11 = arith.constant 0 : index
    %c0_12 = arith.constant 0 : index
    %21 = vector.load %arg4[%c0_11, %c0_12] : memref<8x128xf32, #tpu.memory_space<vmem>>, vector<8x128xf32>
    tpu.vector_store %arg4[%c0_11, %c0_12], %20 {strides = array<i32>} : memref<8x128xf32, #tpu.memory_space<vmem>>, vector<8x128xf32>,
    return
  }
  func.func @transform_0(%arg0: i32) -> (i32, i32) {
    %c0_i32 = arith.constant 0 : i32
    %c0_i32_0 = arith.constant 0 : i32
    return %arg0, %c0_i32 : i32, i32
  }
  func.func @transform_1(%arg0: i32) -> (i32, i32) {
    %c0_i32 = arith.constant 0 : i32
    %c0_i32_0 = arith.constant 0 : i32
    %c0_i32_1 = arith.constant 0 : i32
    return %c0_i32, %c0_i32_0 : i32, i32
  }
  func.func @transform_2(%arg0: i32) -> (i32, i32) {
    %c0_i32 = arith.constant 0 : i32
    %c0_i32_0 = arith.constant 0 : i32
    %c0_i32_1 = arith.constant 0 : i32
    return %c0_i32, %c0_i32_0 : i32, i32
  }
  func.func @transform_3(%arg0: i32) -> (i32, i32) {
    %c0_i32 = arith.constant 0 : i32
    %c0_i32_0 = arith.constant 0 : i32
    return %arg0, %c0_i32 : i32, i32
  }
}

</mosaic_0001>

<bundles_post_ra>
// kernel: tpu_custom_call.1
= control target key start
LH: loop header
LB: loop body
LE: loop exit
PB: predicated region body
PF: predicated region fallthrough
CT: control target
= control target key end

     0   :  { %8 = vsyncpa [#allocation3], 0  ;;  %s329_s0 = inlined_call_operand.hbm [shape: f32[8,16], index: 0, kind: input, shape index: {}]   ;;  %s330_s1 = inlined_call_operand.hbm [shape: f32[272,128], index: 1, kind: input, shape index: {}]   ;;  %s331_s2 = inlined_call_operand.hbm [shape: f32[3,128], index: 2, kind: input, shape index: {}]   ;;  %s332_s3 = inlined_call_operand.hbm [shape: f32[8,128], index: 3, kind: output, shape index: {}]  }
   0x1   :  { %9 = vsyncpa [#allocation6], 0  ;;  %s26_s14 = sshll.u32 %s330_s1, 4  ;;  %s27_s14 = int_to_ptr.hbm [resolvable:$true] %s26_s14 }
   0x2   :  { %10 = vsyncpa [#allocation4], 0  ;;  %s291_s15 = smov [#allocation5]   ;;  %s16_s19 = sshll.u32 %s329_s0, 4  ;;  %s17_s19 = int_to_ptr.hbm [resolvable:$true] %s16_s19 }
   0x3   :  { %s28_s16 = sshll.u32 %s291_s15, 4  ;;  %s292_s20 = smov 128   ;;  %s29_s16 = int_to_ptr.vmem [resolvable:$true] %s28_s16 }
   0x4   :  { %s293_s21 = smov 8   ;;  %s294_s22 = smov [#allocation2]  }
   0x5   :  { %34 = dma.hbm_to_vmem [thread:$0]  %s27_s14, 4352, %s29_s16, [#allocation6], %s292_s20, %s292_s20, %s293_s21  }
   0x6   :  { %s18_s23 = sshll.u32 %s294_s22, 4  ;;  %s40_s26 = sshll.u32 %s331_s2, 4  ;;  %s19_s23 = int_to_ptr.vmem [resolvable:$true] %s18_s23  ;;  %s41_s26 = int_to_ptr.hbm [resolvable:$true] %s40_s26 }
   0x7   :  { %21 = dma.hbm_to_vmem [thread:$0]  %s17_s19, 128, %s19_s23, [#allocation3]  }
   0x8   :  { %s295_s1 = smov [#allocation7]  }
   0x9   :  { %s42_s27 = sshll.u32 %s295_s1, 4  ;;  %s43_s27 = int_to_ptr.vmem [resolvable:$true] %s42_s27 }
   0xa   :  { %45 = dma.hbm_to_vmem [thread:$0]  %s41_s26, 64, %s43_s27, [#allocation6]  }
   0xb   :  { %285 = dma.done.wait [#allocation3], 128  }
   0xc   :  { %286 = vsyncadd [#allocation3], 4294967168 }
   0xd   :  { %287 = dma.done.wait [#allocation6], 4416  }
   0xe   :  { %288 = vsyncadd [#allocation6], 4294962880  ;;  %v60_v0 = vld [vmem:[#allocation5 + $0x8] sm:$0xff]  ;;  %v59_v1 = vld [vmem:[#allocation5] sm:$0xff]  ;;  %vm95_vm0 = vcmask 130048   ;;  %s296_s0 = smov [#allocation8]  }
   0xf   :  { %113 = vmatpush.msra.mxu0 %v60_v0  ;;  %v58_v2 = vld [vmem:[#allocation2] sm:$0xff]  ;;  %v76_v3 = vld [vmem:[#allocation5 + $0x88] sm:$0xff]  ;;  %v75_v4 = vld [vmem:[#allocation5 + $0x80] sm:$0xff]  ;;  %s169_s2 = sshll.u32 %s296_s0, 4  ;;  %s171_s30 = sshll.u32 %s332_s3, 4  ;;  %s170_s2 = int_to_ptr.vmem [resolvable:$true] %s169_s2  ;;  %s172_s30 = int_to_ptr.hbm [resolvable:$true] %s171_s30 }
  0x10   :  { %121 = vmatpush.msra.mxu1 %v76_v3  ;;  %v74_v5 = vld [vmem:[#allocation5 + $0x78] sm:$0xff]  ;;  %v73_v6 = vld [vmem:[#allocation5 + $0x70] sm:$0xff]  ;;  %v72_v7 = vld [vmem:[#allocation5 + $0x68] sm:$0xff] }
  0x11   :  { %114 = vmatpush.msra.mxu0 %v59_v1  ;;  %v71_v8 = vld [vmem:[#allocation5 + $0x60] sm:$0xff]  ;;  %v70_v9 = vld [vmem:[#allocation5 + $0x58] sm:$0xff]  ;;  %v69_v10 = vld [vmem:[#allocation5 + $0x50] sm:$0xff] }
  0x12   :  { %182 = vmatmul.msk.f32.vlgmr.msra.gmra.mxu0 %vm95_vm0, %v58_v2  ;;  %122 = vmatpush.msra.mxu1 %v75_v4  ;;  %v68_v11 = vld [vmem:[#allocation5 + $0x48] sm:$0xff]  ;;  %v67_v12 = vld [vmem:[#allocation5 + $0x40] sm:$0xff]  ;;  %v66_v13 = vld [vmem:[#allocation5 + $0x38] sm:$0xff] }
  0x13   :  { %v65_v14 = vld [vmem:[#allocation5 + $0x30] sm:$0xff]  ;;  %v64_v15 = vld [vmem:[#allocation5 + $0x28] sm:$0xff]  ;;  %v63_v16 = vld [vmem:[#allocation5 + $0x20] sm:$0xff] }
  0x14   :  { %123 = vmatpush.msra.mxu1 %v74_v5  ;;  %v62_v17 = vld [vmem:[#allocation5 + $0x18] sm:$0xff]  ;;  %v61_v18 = vld [vmem:[#allocation5 + $0x10] sm:$0xff]  ;;  %v92_v19 = vld [vmem:[#allocation5 + $0x108] sm:$0xff] }
  0x15   :  { %v91_v20 = vld [vmem:[#allocation5 + $0x100] sm:$0xff]  ;;  %143 = vmatpush.msra.mxu2 %v92_v19  ;;  %v90_v21 = vld [vmem:[#allocation5 + $0xf8] sm:$0xff]  ;;  %v89_v22 = vld [vmem:[#allocation5 + $0xf0] sm:$0xff] }
  0x16   :  { %124 = vmatpush.msra.mxu1 %v73_v6  ;;  %v88_v23 = vld [vmem:[#allocation5 + $0xe8] sm:$0xff]  ;;  %v87_v24 = vld [vmem:[#allocation5 + $0xe0] sm:$0xff]  ;;  %v86_v25 = vld [vmem:[#allocation5 + $0xd8] sm:$0xff] }
  0x17   :  { %144 = vmatpush.msra.mxu2 %v91_v20  ;;  %v85_v26 = vld [vmem:[#allocation5 + $0xd0] sm:$0xff]  ;;  %v84_v27 = vld [vmem:[#allocation5 + $0xc8] sm:$0xff]  ;;  %v83_v28 = vld [vmem:[#allocation5 + $0xc0] sm:$0xff] }
  0x18   :  { %125 = vmatpush.msra.mxu1 %v72_v7  ;;  %v82_v29 = vld [vmem:[#allocation5 + $0xb8] sm:$0xff]  ;;  %v81_v30 = vld [vmem:[#allocation5 + $0xb0] sm:$0xff]  ;;  %v80_v32 = vld [vmem:[#allocation5 + $0xa8] sm:$0xff] }
  0x19   :  { %145 = vmatpush.msra.mxu2 %v90_v21  ;;  %v93_v31 = vld [vmem:[#allocation7] sm:$0x7]  ;;  %v79_v37 = vld [vmem:[#allocation5 + $0xa0] sm:$0xff]  ;;  %v78_v38 = vld [vmem:[#allocation5 + $0x98] sm:$0xff] }
  0x1a   :  { %126 = vmatpush.msra.mxu1 %v71_v8  ;;  %v94_v33 = vperm.slane %v93_v31, 0  ;;  %v77_v39 = vld [vmem:[#allocation5 + $0x90] sm:$0xff]  ;;  %v120_v40 = vperm.slane %v93_v31, 1  ;;  %v142_v44 = vperm.slane %v93_v31, 2 }
  0x1b   :  { %146 = vmatpush.msra.mxu2 %v89_v22 }
  0x1c   :  { %127 = vmatpush.msra.mxu1 %v70_v9 }
  0x1d   :  { %147 = vmatpush.msra.mxu2 %v88_v23 }
  0x1e   :  { %128 = vmatpush.msra.mxu1 %v69_v10 }
  0x1f   :  { %148 = vmatpush.msra.mxu2 %v87_v24 }
  0x20   :  { %129 = vmatpush.msra.mxu1 %v68_v11 }
  0x21   :  { %149 = vmatpush.msra.mxu2 %v86_v25 }
  0x22   :  { %130 = vmatpush.msra.mxu1 %v67_v12 }
  0x23   :  { %150 = vmatpush.msra.mxu2 %v85_v26 }
  0x24   :  { %131 = vmatpush.msra.mxu1 %v66_v13 }
  0x25   :  { %151 = vmatpush.msra.mxu2 %v84_v27 }
  0x26   :  { %132 = vmatpush.msra.mxu1 %v65_v14 }
  0x27   :  { %152 = vmatpush.msra.mxu2 %v83_v28 }
  0x28   :  { %133 = vmatpush.msra.mxu1 %v64_v15 }
  0x29   :  { %153 = vmatpush.msra.mxu2 %v82_v29 }
  0x2a   :  { %134 = vmatpush.msra.mxu1 %v63_v16 }
  0x2b   :  { %154 = vmatpush.msra.mxu2 %v81_v30 }
  0x2c   :  { %135 = vmatpush.msra.mxu1 %v62_v17 }
  0x2d   :  { %155 = vmatpush.msra.mxu2 %v80_v32 }
  0x2e   :  { %136 = vmatpush.msra.mxu1 %v61_v18 }
  0x2f   :  { %156 = vmatpush.msra.mxu2 %v79_v37 }
  0x31   :  { %157 = vmatpush.msra.mxu2 %v78_v38 }
  0x33   :  { %158 = vmatpush.msra.mxu2 %v77_v39 }
  0x8f   :  { %v116_v34 = vpop.f32.mrf.mxu0 }
  0x90   :  { %v117_v35 = vadd.f32 %v116_v34, %v94_v33 }
  0x92   :  { %v119_v36 = vmax.f32 %v117_v35, 0.0 }
  0x94   :  { %137 = vmatmul.f32.vlgmr.msra.gmra.mxu1 %v119_v36 }
 0x111   :  { %v138_v41 = vpop.f32.mrf.mxu1 }
 0x112   :  { %v139_v42 = vadd.f32 %v138_v41, %v120_v40 }
 0x114   :  { %v141_v43 = vmax.f32 %v139_v42, 0.0 }
 0x116   :  { %159 = vmatmul.f32.vlgmr.msra.gmra.mxu2 %v141_v43 }
 0x199   :  { %v160_v45 = vpop.f32.mrf.mxu2 }
 0x19a   :  { %v161_v46 = vadd.f32 %v160_v45, %v142_v44 }
 0x19c   :  { %163 = vst [vmem:[#allocation8] sm:$0xff] %v161_v46 }
 0x19d   :  { %174 = dma.vmem_to_hbm [thread:$0]  %s170_s2, 128, %s172_s30, [#allocation4]  }
 0x19e   :  { %289 = dma.done.wait [#allocation4], 128  }
 0x19f   :  { %290 = vsyncadd [#allocation4], 4294967168 }
 0x1a0   :  { %179 = vsyncpa [#allocation3], 1 }
 0x1a1   :  { %180 = vsyncpa [#allocation6], 1 }
 0x1a2   :  { %181 = vsyncpa [#allocation4], 1 }

</bundles_post_ra>
